<compile_context>
chip_gen: v5e
topology: v5e:2x2
jax: 0.10.0
libtpu: 0.0.40
codegen_flags: <defaults>
</compile_context>

<pallas_src>
import functools

import jax
import jax.numpy as jnp
from jax.experimental import pallas as pl
from jax.experimental.pallas import tpu as pltpu

EPS = 1e-5


def plusdown_kernel(x_ref, w1_ref, w2_ref, p_ref, shift_ref, o_ref, *, inv_hw):
    """One grid step: Nb samples, two (conv3x3 -> InstanceNorm -> ReLU) layers.

    x_ref:     (Nb, H, W*Cin)       lane-dense input rows
    w1_ref:    (W*Cin,  3*W*Cout)   block-Toeplitz conv0 weight (kh = 0,1,2 column blocks)
    w2_ref:    (W*Cout, 3*W*Cout)   block-Toeplitz conv1 weight
    p_ref:     (W*Cout, W*Cout)     0/1 selector: per-channel sum + broadcast over lanes
    shift_ref: (2, Nb*H, Nb*H)      0/1 row-shift matrices [down, up], block-diag per sample
    o_ref:     (Nb, H, W*Cout)      lane-dense output rows
    """
    Nb, H, _ = x_ref.shape
    WC = o_ref.shape[2]
    NbH = Nb * H

    p_sel = p_ref[...]
    s_down = shift_ref[0]   # y[h] += z_kh0[h-1]  (zero at h == 0, per sample)
    s_up = shift_ref[1]     # y[h] += z_kh2[h+1]  (zero at h == H-1, per sample)

    def conv_in_relu(x2d, w_ref):
        # 3x3 conv == ONE MXU matmul against the width-folded block-Toeplitz weight;
        # the 3 vertical taps are then combined with two tiny 0/1-matrix matmuls
        # (no concat / zero-pad copies; padding rows and sample boundaries are
        # handled by the zeros in the shift matrices).
        z = jnp.dot(x2d.astype(w_ref.dtype), w_ref[...],
                    preferred_element_type=jnp.float32)              # (NbH, 3*WC)
        y = (z[:, WC:2 * WC]
             + jnp.dot(s_down, z[:, 0:WC], preferred_element_type=jnp.float32)
             + jnp.dot(s_up, z[:, 2 * WC:], preferred_element_type=jnp.float32))
        # NOTE: no conv bias here -- a per-channel constant is exactly cancelled
        # by the affine-free InstanceNorm mean subtraction (dead work removed).

        # InstanceNorm2d (affine=False), single pass, lane-dense: the per-channel
        # reduce + broadcast across the fused (W*C) lane axis is one matmul.
        # (Single-pass E[x^2]-E[x]^2 in f32 is fine at these reduction sizes.)
        y3 = y.reshape(Nb, H, WC)
        s1 = jnp.sum(y3, axis=1)                                     # (Nb, WC)
        s2 = jnp.sum(y3 * y3, axis=1)                                # (Nb, WC)
        stats = jnp.concatenate([s1, s2], axis=0)                    # (2*Nb, WC)
        bstats = jnp.dot(stats, p_sel, preferred_element_type=jnp.float32) * inv_hw
        mean = bstats[:Nb][:, None, :]                               # (Nb, 1, WC)
        var = bstats[Nb:][:, None, :] - mean * mean                  # biased (PyTorch)
        yn = (y3 - mean) * jax.lax.rsqrt(var + EPS)
        # Dropout2d(p=0.0) is the identity; ReLU:
        return jnp.maximum(yn, 0.0).reshape(NbH, WC)

    y1 = conv_in_relu(x_ref[...].reshape(NbH, -1), w1_ref)
    y2 = conv_in_relu(y1, w2_ref)
    o_ref[...] = y2.reshape(Nb, H, WC).astype(o_ref.dtype)


def _toeplitz_weight(w, w_sp):
    """Fold the kw taps of a 3x3 HWIO kernel into a block-Toeplitz matmul weight.

    w: (3, 3, Cin, Cout) -> (w_sp*Cin, 3*w_sp*Cout). Column block kh holds
    W[kh][w_src*Cin+ci, w_out*Cout+co] = w[kh, w_src-w_out+1, ci, co], zero
    outside the band (which implements the width-direction zero padding).
    """
    _, _, cin, cout = w.shape
    w = w.astype(jnp.float32)
    big = jnp.zeros((3, w_sp, cin, w_sp, cout), jnp.float32)  # [kh, w_src, ci, w_out, co]
    iw = jnp.arange(w_sp)
    for dw in range(3):
        src = iw + dw - 1
        valid = (src >= 0) & (src < w_sp)
        src_c = jnp.clip(src, 0, w_sp - 1)
        vals = jnp.where(valid[:, None, None, None],
                         jnp.broadcast_to(w[:, dw, :, :][None], (w_sp, 3, cin, cout)),
                         0.0)
        big = big.at[:, src_c, :, iw, :].add(vals)
    return big.transpose(1, 2, 0, 3, 4).reshape(w_sp * cin, 3 * w_sp * cout)


def _tpu_config():
    """Best-effort per-generation tuning: (vmem_limit_bytes | None, block_budget, num_tc)."""
    kind = ""
    try:
        kind = jax.devices()[0].device_kind.lower()
    except Exception:
        pass
    if "v6" in kind or "v5e" in kind or "v5 lite" in kind or "v5lite" in kind:
        # 128 MiB physical VMEM, 1 TensorCore: large blocks, raised scoped limit.
        return 64 << 20, 28 << 20, 1
    if "v7" in kind or "7x" in kind:
        # 64 MiB physical VMEM, 2 TensorCores share the 'parallel' batch axis.
        return 32 << 20, 14 << 20, 2
    if "v5" in kind:
        # v5p: 128 MiB VMEM, megacore.
        return 64 << 20, 28 << 20, 2
    # Unknown chip: keep the compiler's default scoped-VMEM limit, modest block.
    return None, 8 << 20, 2


def _pick_block_n(n, h, w, cin, cout, budget_bytes, num_tc, itemsize=4):
    """Samples per grid step.

    Picks the largest divisor of n whose total VMEM footprint (double-buffered
    in/out blocks + double-buffered grid-invariant operands + in-kernel f32
    intermediates + shift matrices) fits the budget, while keeping the step
    count a multiple of the TensorCore count (v7x shards the 'parallel' batch
    axis across 2 TCs -- an odd step count strands one TC for a step).
    """
    wc, wcin = w * cout, w * cin
    const = 2 * itemsize * (wcin * 3 * wc + wc * 3 * wc) + 2 * 4 * wc * wc

    def footprint(bn):
        nbh = bn * h
        blocks = 2 * bn * h * (itemsize * wcin + 4 * wc)   # dbl-buffered x / out blocks
        temps = 4 * bn * h * 8 * wc                        # z, y, y*y, yn, y1 slabs (f32)
        shifts = 2 * 2 * 4 * nbh * nbh                     # dbl-buffered (2, NbH, NbH) f32
        return const + blocks + temps + shifts

    best = 1
    for d in range(2, n + 1):
        if n % d:
            continue
        if footprint(d) > budget_bytes:
            continue
        steps = n // d
        if n >= num_tc and (steps < num_tc or steps % num_tc):
            continue
        best = d
    return best


def plus_down_block_nhwc(x_nhwc, w1, w2, *, block_n=None,
                         conv_dtype=jnp.float32, out_dtype=jnp.float32):
    """Lane-dense fast path: x (N,H,W,Cin) -> (N,H,W,Cout), no HBM transposes.

    Conv biases are omitted because InstanceNorm(affine=False) cancels them
    exactly. Set conv_dtype=jnp.bfloat16 / out_dtype=jnp.bfloat16 to halve
    matmul-input / output HBM bytes when the accuracy budget allows.
    """
    N, H, W, Cin = x_nhwc.shape
    Cout = w1.shape[-1]
    WC = W * Cout  # perf assumption (not required for correctness): multiple of 128

    # Lane-dense activations: each image row is a flat (W*C) lane vector; the
    # reshape below is free (no transpose, no HBM round trip).
    x_rows = x_nhwc.astype(conv_dtype).reshape(N, H, W * Cin)

    w1_cat = _toeplitz_weight(w1, W).astype(conv_dtype)          # (W*Cin,  3*W*Cout)
    w2_cat = _toeplitz_weight(w2, W).astype(conv_dtype)          # (W*Cout, 3*W*Cout)
    p_sel = jnp.tile(jnp.eye(Cout, dtype=jnp.float32), (W, W))   # (WC, WC)

    vmem_limit, budget, num_tc = _tpu_config()
    if block_n is None:
        block_n = _pick_block_n(N, H, W, Cin, Cout, budget, num_tc,
                                itemsize=jnp.dtype(conv_dtype).itemsize)
    assert N % block_n == 0, (N, block_n)
    NbH = block_n * H

    # 0/1 row-shift matrices (block-diagonal per sample): combine the kh=0/kh=2
    # vertical taps with two tiny MXU matmuls instead of concat-shifted copies.
    i = jnp.arange(NbH)
    same_img = (i[:, None] // H) == (i[None, :] // H)
    s_down = (same_img & (i[:, None] - i[None, :] == 1)).astype(jnp.float32)
    s_up = (same_img & (i[None, :] - i[:, None] == 1)).astype(jnp.float32)
    shifts = jnp.stack([s_down, s_up])                           # (2, NbH, NbH)

    kernel = functools.partial(plusdown_kernel, inv_hw=1.0 / (H * W))

    cp = dict(dimension_semantics=("parallel",))
    if vmem_limit is not None:
        cp["vmem_limit_bytes"] = vmem_limit

    # TODO(synk): for very large feature maps, tile H with a 1-row halo and tile W
    # into <=128/Cin column groups (the block-Toeplitz weight grows as (W*C)^2 and
    # will not fit v7x's 64 MiB VMEM); also single-buffer the grid-invariant
    # operands (pipeline_mode=pl.Buffered(1)) once that path is validated.
    out_rows = pl.pallas_call(
        kernel,
        out_shape=jax.ShapeDtypeStruct((N, H, WC), out_dtype),
        grid_spec=pltpu.PrefetchScalarGridSpec(
            num_scalar_prefetch=0,
            grid=(N // block_n,),
            in_specs=[
                pl.BlockSpec((block_n, H, W * Cin), lambda n: (n, 0, 0)),
                pl.BlockSpec((W * Cin, 3 * WC), lambda n: (0, 0)),
                pl.BlockSpec((WC, 3 * WC), lambda n: (0, 0)),
                pl.BlockSpec((WC, WC), lambda n: (0, 0)),
                pl.BlockSpec((2, NbH, NbH), lambda n: (0, 0, 0)),
            ],
            out_specs=pl.BlockSpec((block_n, H, WC), lambda n: (n, 0, 0)),
        ),
        compiler_params=pltpu.CompilerParams(**cp),
    )(x_rows, w1_cat, w2_cat, p_sel, shifts)

    return out_rows.reshape(N, H, W, Cout)                       # free reshape back


def plus_down_block(x_nchw, w1, b1, w2, b2, **kwargs):
    """PyTorch-layout drop-in: NCHW in / NCHW out.

    The two transposes here are layout glue for compatibility only -- production
    callers should use plus_down_block_nhwc and keep activations lane-dense
    end-to-end (saves two full HBM round trips of the activations).
    b1/b2 are accepted for interface parity with the nn.Module but are
    mathematically dead: a per-channel constant added before an affine-free
    InstanceNorm is removed exactly by the mean subtraction.
    """
    del b1, b2  # cancelled exactly by InstanceNorm(affine=False)
    x_nhwc = jnp.transpose(x_nchw, (0, 2, 3, 1))
    y = plus_down_block_nhwc(x_nhwc, w1, w2, **kwargs)
    return jnp.transpose(y, (0, 3, 1, 2))


def ref_forward(x_nchw, w1, b1, w2, b2):
    """Pure-JAX reference (lax.conv, WITH conv biases) for correctness checking."""
    x = jnp.transpose(x_nchw, (0, 2, 3, 1)).astype(jnp.float32)

    def layer(x, w, b):
        y = jax.lax.conv_general_dilated(
            x, w.astype(jnp.float32), window_strides=(1, 1),
            padding=((1, 1), (1, 1)),
            dimension_numbers=("NHWC", "HWIO", "NHWC")) + b.astype(jnp.float32)
        mean = jnp.mean(y, axis=(1, 2), keepdims=True)
        var = jnp.mean((y - mean) ** 2, axis=(1, 2), keepdims=True)
        y = (y - mean) * jax.lax.rsqrt(var + EPS)
        return jnp.maximum(y, 0.0)

    y = layer(layer(x, w1, b1), w2, b2)
    return jnp.transpose(y, (0, 3, 1, 2))


if __name__ == "__main__":
    key = jax.random.PRNGKey(0)
    kx, k1, kb1, k2, kb2 = jax.random.split(key, 5)

    N, Cin, H, W, Cout = 2, 4, 16, 16, 8
    x = jax.random.normal(kx, (N, Cin, H, W), jnp.float32)
    # conv0: Conv2d(Cin -> Cout, 3x3, bias) ; conv1: Conv2d(Cout -> Cout, 3x3, bias)
    w1 = jax.random.normal(k1, (3, 3, Cin, Cout), jnp.float32) * 0.1
    b1 = jax.random.normal(kb1, (Cout,), jnp.float32) * 0.1
    w2 = jax.random.normal(k2, (3, 3, Cout, Cout), jnp.float32) * 0.1
    b2 = jax.random.normal(kb2, (Cout,), jnp.float32) * 0.1

    out = plus_down_block(x, w1, b1, w2, b2)
    out = jax.block_until_ready(out)

    ref = ref_forward(x, w1, b1, w2, b2)   # reference includes the (cancelled) biases
    assert out.shape == (N, Cout, H, W), out.shape
    err = float(jnp.max(jnp.abs(out - ref)))
    assert jnp.allclose(out, ref, atol=1e-4, rtol=1e-4), err
    print("KERNEL_OK")
</pallas_src>

<mosaic_0001>
module attributes {stable_mosaic.version = 11 : i64} {
  func.func @plusdown_kernel(%arg0: i32, %arg1: memref<1x16x64xf32, #tpu.memory_space<vmem>>, %arg2: memref<64x384xf32, #tpu.memory_space<vmem>>, %arg3: memref<128x384xf32, #tpu.memory_space<vmem>>, %arg4: memref<128x128xf32, #tpu.memory_space<vmem>>, %arg5: memref<2x16x16xf32, #tpu.memory_space<vmem>>, %arg6: memref<1x16x128xf32, #tpu.memory_space<vmem>>) attributes {dimension_semantics = [#tpu.dimension_semantics<parallel>], iteration_bounds = array<i64: 2>, scalar_prefetch = 0 : i64, scratch_operands = 0 : i64, tpu.core_type = #tpu.core_type<tc>, window_params = [{transform_indices = @transform_0, window_bounds = array<i64: 1, 16, 64>}, {pipeline_mode = #tpu.pipeline_mode<synchronous>, transform_indices = @transform_1, window_bounds = array<i64: 64, 384>}, {pipeline_mode = #tpu.pipeline_mode<synchronous>, transform_indices = @transform_2, window_bounds = array<i64: 128, 384>}, {pipeline_mode = #tpu.pipeline_mode<synchronous>, transform_indices = @transform_3, window_bounds = array<i64: 128, 128>}, {pipeline_mode = #tpu.pipeline_mode<synchronous>, transform_indices = @transform_4, window_bounds = array<i64: 2, 16, 16>}, {transform_indices = @transform_5, window_bounds = array<i64: 1, 16, 128>}]} {
    %c0 = arith.constant 0 : index
    %c0_0 = arith.constant 0 : index
    %0 = vector.load %arg4[%c0, %c0_0] : memref<128x128xf32, #tpu.memory_space<vmem>>, vector<128x128xf32>
    %c0_1 = arith.constant 0 : index
    %c0_2 = arith.constant 0 : index
    %c0_3 = arith.constant 0 : index
    %1 = vector.load %arg5[%c0_1, %c0_2, %c0_3] : memref<2x16x16xf32, #tpu.memory_space<vmem>>, vector<1x16x16xf32>
    %2 = vector.shape_cast %1 : vector<1x16x16xf32> to vector<16x16xf32>
    %c1 = arith.constant 1 : index
    %c0_4 = arith.constant 0 : index
    %c0_5 = arith.constant 0 : index
    %3 = vector.load %arg5[%c1, %c0_4, %c0_5] : memref<2x16x16xf32, #tpu.memory_space<vmem>>, vector<1x16x16xf32>
    %4 = vector.shape_cast %3 : vector<1x16x16xf32> to vector<16x16xf32>
    %c0_6 = arith.constant 0 : index
    %c0_7 = arith.constant 0 : index
    %c0_8 = arith.constant 0 : index
    %5 = vector.load %arg1[%c0_6, %c0_7, %c0_8] : memref<1x16x64xf32, #tpu.memory_space<vmem>>, vector<1x16x64xf32>
    %6 = vector.shape_cast %5 : vector<1x16x64xf32> to vector<16x64xf32>
    %c0_9 = arith.constant 0 : index
    %c0_10 = arith.constant 0 : index
    %7 = vector.load %arg2[%c0_9, %c0_10] : memref<64x384xf32, #tpu.memory_space<vmem>>, vector<64x384xf32>
    %cst = arith.constant dense<0.000000e+00> : vector<16x384xf32>
    %8 = tpu.matmul %6, %7, %cst {dimension_numbers = #tpu.dot_dimension_numbers<[1], [0], [0], [1], [0, 0, 1, 1], [], []>} : vector<16x64xf32>, vector<64x384xf32>, vector<16x384xf32> -> vector<16x384xf32>
    %9 = vector.extract_strided_slice %8 {offsets = [0, 128], sizes = [16, 128], strides = [1, 1]} : vector<16x384xf32> to vector<16x128xf32>
    %10 = vector.extract_strided_slice %8 {offsets = [0, 0], sizes = [16, 128], strides = [1, 1]} : vector<16x384xf32> to vector<16x128xf32>
    %cst_11 = arith.constant dense<0.000000e+00> : vector<16x128xf32>
    %11 = tpu.matmul %2, %10, %cst_11 {dimension_numbers = #tpu.dot_dimension_numbers<[1], [0], [0], [1], [0, 0, 1, 1], [], []>} : vector<16x16xf32>, vector<16x128xf32>, vector<16x128xf32> -> vector<16x128xf32>
    %12 = arith.addf %9, %11 : vector<16x128xf32>
    %13 = vector.extract_strided_slice %8 {offsets = [0, 256], sizes = [16, 128], strides = [1, 1]} : vector<16x384xf32> to vector<16x128xf32>
    %cst_12 = arith.constant dense<0.000000e+00> : vector<16x128xf32>
    %14 = tpu.matmul %4, %13, %cst_12 {dimension_numbers = #tpu.dot_dimension_numbers<[1], [0], [0], [1], [0, 0, 1, 1], [], []>} : vector<16x16xf32>, vector<16x128xf32>, vector<16x128xf32> -> vector<16x128xf32>
    %15 = arith.addf %12, %14 : vector<16x128xf32>
    %16 = vector.shape_cast %15 : vector<16x128xf32> to vector<1x16x128xf32>
    %cst_13 = arith.constant dense<0.000000e+00> : vector<1x128xf32>
    %17 = vector.multi_reduction <add>, %16, %cst_13 [1] : vector<1x16x128xf32> to vector<1x128xf32>
    %18 = arith.mulf %16, %16 : vector<1x16x128xf32>
    %cst_14 = arith.constant dense<0.000000e+00> : vector<1x128xf32>
    %19 = vector.multi_reduction <add>, %18, %cst_14 [1] : vector<1x16x128xf32> to vector<1x128xf32>
    %20 = tpu.concatenate %17, %19 in 0 : vector<1x128xf32>, vector<1x128xf32> -> vector<2x128xf32>
    %cst_15 = arith.constant dense<0.000000e+00> : vector<2x128xf32>
    %21 = tpu.matmul %20, %0, %cst_15 {dimension_numbers = #tpu.dot_dimension_numbers<[1], [0], [0], [1], [0, 0, 1, 1], [], []>} : vector<2x128xf32>, vector<128x128xf32>, vector<2x128xf32> -> vector<2x128xf32>
    %cst_16 = arith.constant 3.906250e-03 : f32
    %22 = vector.broadcast %cst_16 : f32 to vector<2x128xf32>
    %23 = arith.mulf %21, %22 : vector<2x128xf32>
    %24 = vector.extract_strided_slice %23 {offsets = [0, 0], sizes = [1, 128], strides = [1, 1]} : vector<2x128xf32> to vector<1x128xf32>
    %25 = vector.shape_cast %24 : vector<1x128xf32> to vector<1x1x128xf32>
    %26 = vector.extract_strided_slice %23 {offsets = [1, 0], sizes = [1, 128], strides = [1, 1]} : vector<2x128xf32> to vector<1x128xf32>
    %27 = vector.shape_cast %26 : vector<1x128xf32> to vector<1x1x128xf32>
    %28 = arith.mulf %25, %25 : vector<1x1x128xf32>
    %29 = arith.subf %27, %28 : vector<1x1x128xf32>
    %30 = vector.broadcast %25 : vector<1x1x128xf32> to vector<1x16x128xf32>
    %31 = arith.subf %16, %30 : vector<1x16x128xf32>
    %cst_17 = arith.constant 9.99999974E-6 : f32
    %32 = vector.broadcast %cst_17 : f32 to vector<1x1x128xf32>
    %33 = arith.addf %29, %32 : vector<1x1x128xf32>
    %34 = math.rsqrt %33 : vector<1x1x128xf32>
    %35 = vector.broadcast %34 : vector<1x1x128xf32> to vector<1x16x128xf32>
    %36 = arith.mulf %31, %35 : vector<1x16x128xf32>
    %cst_18 = arith.constant 0.000000e+00 : f32
    %37 = vector.broadcast %cst_18 : f32 to vector<1x16x128xf32>
    %38 = arith.maximumf %36, %37 : vector<1x16x128xf32>
    %39 = vector.shape_cast %38 : vector<1x16x128xf32> to vector<16x128xf32>
    %c0_19 = arith.constant 0 : index
    %c0_20 = arith.constant 0 : index
    %40 = vector.load %arg3[%c0_19, %c0_20] : memref<128x384xf32, #tpu.memory_space<vmem>>, vector<128x384xf32>
    %cst_21 = arith.constant dense<0.000000e+00> : vector<16x384xf32>
    %41 = tpu.matmul %39, %40, %cst_21 {dimension_numbers = #tpu.dot_dimension_numbers<[1], [0], [0], [1], [0, 0, 1, 1], [], []>} : vector<16x128xf32>, vector<128x384xf32>, vector<16x384xf32> -> vector<16x384xf32>
    %42 = vector.extract_strided_slice %41 {offsets = [0, 128], sizes = [16, 128], strides = [1, 1]} : vector<16x384xf32> to vector<16x128xf32>
    %43 = vector.extract_strided_slice %41 {offsets = [0, 0], sizes = [16, 128], strides = [1, 1]} : vector<16x384xf32> to vector<16x128xf32>
    %cst_22 = arith.constant dense<0.000000e+00> : vector<16x128xf32>
    %44 = tpu.matmul %2, %43, %cst_22 {dimension_numbers = #tpu.dot_dimension_numbers<[1], [0], [0], [1], [0, 0, 1, 1], [], []>} : vector<16x16xf32>, vector<16x128xf32>, vector<16x128xf32> -> vector<16x128xf32>
    %45 = arith.addf %42, %44 : vector<16x128xf32>
    %46 = vector.extract_strided_slice %41 {offsets = [0, 256], sizes = [16, 128], strides = [1, 1]} : vector<16x384xf32> to vector<16x128xf32>
    %cst_23 = arith.constant dense<0.000000e+00> : vector<16x128xf32>
    %47 = tpu.matmul %4, %46, %cst_23 {dimension_numbers = #tpu.dot_dimension_numbers<[1], [0], [0], [1], [0, 0, 1, 1], [], []>} : vector<16x16xf32>, vector<16x128xf32>, vector<16x128xf32> -> vector<16x128xf32>
    %48 = arith.addf %45, %47 : vector<16x128xf32>
    %49 = vector.shape_cast %48 : vector<16x128xf32> to vector<1x16x128xf32>
    %cst_24 = arith.constant dense<0.000000e+00> : vector<1x128xf32>
    %50 = vector.multi_reduction <add>, %49, %cst_24 [1] : vector<1x16x128xf32> to vector<1x128xf32>
    %51 = arith.mulf %49, %49 : vector<1x16x128xf32>
    %cst_25 = arith.constant dense<0.000000e+00> : vector<1x128xf32>
    %52 = vector.multi_reduction <add>, %51, %cst_25 [1] : vector<1x16x128xf32> to vector<1x128xf32>
    %53 = tpu.concatenate %50, %52 in 0 : vector<1x128xf32>, vector<1x128xf32> -> vector<2x128xf32>
    %cst_26 = arith.constant dense<0.000000e+00> : vector<2x128xf32>
    %54 = tpu.matmul %53, %0, %cst_26 {dimension_numbers = #tpu.dot_dimension_numbers<[1], [0], [0], [1], [0, 0, 1, 1], [], []>} : vector<2x128xf32>, vector<128x128xf32>, vector<2x128xf32> -> vector<2x128xf32>
    %cst_27 = arith.constant 3.906250e-03 : f32
    %55 = vector.broadcast %cst_27 : f32 to vector<2x128xf32>
    %56 = arith.mulf %54, %55 : vector<2x128xf32>
    %57 = vector.extract_strided_slice %56 {offsets = [0, 0], sizes = [1, 128], strides = [1, 1]} : vector<2x128xf32> to vector<1x128xf32>
    %58 = vector.shape_cast %57 : vector<1x128xf32> to vector<1x1x128xf32>
    %59 = vector.extract_strided_slice %56 {offsets = [1, 0], sizes = [1, 128], strides = [1, 1]} : vector<2x128xf32> to vector<1x128xf32>
    %60 = vector.shape_cast %59 : vector<1x128xf32> to vector<1x1x128xf32>
    %61 = arith.mulf %58, %58 : vector<1x1x128xf32>
    %62 = arith.subf %60, %61 : vector<1x1x128xf32>
    %63 = vector.broadcast %58 : vector<1x1x128xf32> to vector<1x16x128xf32>
    %64 = arith.subf %49, %63 : vector<1x16x128xf32>
    %cst_28 = arith.constant 9.99999974E-6 : f32
    %65 = vector.broadcast %cst_28 : f32 to vector<1x1x128xf32>
    %66 = arith.addf %62, %65 : vector<1x1x128xf32>
    %67 = math.rsqrt %66 : vector<1x1x128xf32>
    %68 = vector.broadcast %67 : vector<1x1x128xf32> to vector<1x16x128xf32>
    %69 = arith.mulf %64, %68 : vector<1x16x128xf32>
    %cst_29 = arith.constant 0.000000e+00 : f32
    %70 = vector.broadcast %cst_29 : f32 to vector<1x16x128xf32>
    %71 = arith.maximumf %69, %70 : vector<1x16x128xf32>
    %72 = vector.shape_cast %71 : vector<1x16x128xf32> to vector<16x128xf32>
    %73 = vector.shape_cast %72 : vector<16x128xf32> to vector<1x16x128xf32>
    %c0_30 = arith.constant 0 : index
    %c0_31 = arith.constant 0 : index
    %c0_32 = arith.constant 0 : index
    %74 = vector.load %arg6[%c0_30, %c0_31, %c0_32] : memref<1x16x128xf32, #tpu.memory_space<vmem>>, vector<1x16x128xf32>
    tpu.vector_store %arg6[%c0_30, %c0_31, %c0_32], %73 {strides = array<i32>} : memref<1x16x128xf32, #tpu.memory_space<vmem>>, vector<1x16x128xf32>,
    return
  }
  func.func @transform_0(%arg0: i32) -> (i32, i32, i32) {
    %c0_i32 = arith.constant 0 : i32
    %c0_i32_0 = arith.constant 0 : i32
    %c0_i32_1 = arith.constant 0 : i32
    return %arg0, %c0_i32, %c0_i32_0 : i32, i32, i32
  }
  func.func @transform_1(%arg0: i32) -> (i32, i32) {
    %c0_i32 = arith.constant 0 : i32
    %c0_i32_0 = arith.constant 0 : i32
    %c0_i32_1 = arith.constant 0 : i32
    return %c0_i32, %c0_i32_0 : i32, i32
  }
  func.func @transform_2(%arg0: i32) -> (i32, i32) {
    %c0_i32 = arith.constant 0 : i32
    %c0_i32_0 = arith.constant 0 : i32
    %c0_i32_1 = arith.constant 0 : i32
    return %c0_i32, %c0_i32_0 : i32, i32
  }
  func.func @transform_3(%arg0: i32) -> (i32, i32) {
    %c0_i32 = arith.constant 0 : i32
    %c0_i32_0 = arith.constant 0 : i32
    %c0_i32_1 = arith.constant 0 : i32
    return %c0_i32, %c0_i32_0 : i32, i32
  }
  func.func @transform_4(%arg0: i32) -> (i32, i32, i32) {
    %c0_i32 = arith.constant 0 : i32
    %c0_i32_0 = arith.constant 0 : i32
    %c0_i32_1 = arith.constant 0 : i32
    %c0_i32_2 = arith.constant 0 : i32
    return %c0_i32, %c0_i32_0, %c0_i32_1 : i32, i32, i32
  }
  func.func @transform_5(%arg0: i32) -> (i32, i32, i32) {
    %c0_i32 = arith.constant 0 : i32
    %c0_i32_0 = arith.constant 0 : i32
    %c0_i32_1 = arith.constant 0 : i32
    return %arg0, %c0_i32, %c0_i32_0 : i32, i32, i32
  }
}

</mosaic_0001>

<bundles_post_ra>
// kernel: tpu_custom_call.1
= control target key start
LH: loop header
LB: loop body
LE: loop exit
PB: predicated region body
PF: predicated region fallthrough
CT: control target
= control target key end

     0   :  { %10 = vsyncpa [#allocation3], 0  ;;  %s1607_s0 = inlined_call_operand.hbm [shape: f32[2,16,64], index: 0, kind: input, shape index: {}]   ;;  %s1608_s1 = inlined_call_operand.hbm [shape: f32[64,384], index: 1, kind: input, shape index: {}]   ;;  %s1609_s2 = inlined_call_operand.hbm [shape: f32[128,384], index: 2, kind: input, shape index: {}]   ;;  %s1610_s3 = inlined_call_operand.hbm [shape: f32[128,128], index: 3, kind: input, shape index: {}]   ;;  %s1611_s4 = inlined_call_operand.hbm [shape: f32[2,16,16], index: 4, kind: input, shape index: {}]   ;;  %s1612_s5 = inlined_call_operand.hbm [shape: f32[2,16,128], index: 5, kind: output, shape index: {}]  }
   0x1   :  { %12 = vsyncpa [#allocation3 + $0x1], 0 }
   0x2   :  { %13 = vsyncpa [#allocation6], 0 }
   0x3   :  { %14 = vsyncpa [#allocation9], 0 }
   0x4   :  { %15 = vsyncpa [#allocation4], 0 }
   0x5   :  { %17 = vsyncpa [#allocation4 + $0x1], 0  ;;  %s1319_s18 = smov 0   ;;  %s1321_s19 = smov 0  }
   0x6   :  { %s1323_s20 = smov 0   ;;  %s1325_s21 = smov 0  }
   0x7 LB: > { %s1340_s22 = sadd.s32 4294967295, %s1277_s21   ;;  %s918_s23 = sadd.s32 4294967294, %s1277_s21   ;;  %s1277_s21 = sphi %s1325_s21, %s1625_s21   ;;  %s1273_s20 = sphi %s1323_s20, %s1624_s20   ;;  %s1269_s19 = sphi %s1321_s19, %s1623_s19   ;;  %s1265_s18 = sphi %s1319_s18, %s1622_s18  }
   0x8   : > { %p43_p0 = scmp.ne.s32.totalorder %s1269_s19, %s1265_s18  ;;  %p44_p1 = scmp.eq.s32.totalorder %s1340_s22, 0 }
   0x9   : > { %p151_p2 = scmp.eq.s32.totalorder %s1340_s22, 1  ;;  %p157_p3 = scmp.eq.s32.totalorder %s918_s23, 1 }
   0xa   : > { %p1349_p4 = por %p44_p1, %p43_p0  ;;  %p919_p5 = scmp.ge.s32.totalorder %s1277_s21, 1 }
   0xb   : > { %p1354_p6 = por %p157_p3, %p43_p0  ;;  %p164_p7 = scmp.lt.s32.totalorder %s1277_s21, 3 }
   0xc   : > { %s175_s28 = sshll.u32 %s1608_s1, 4  ;;  %s1279_s30 = smov [#allocation5]   ;;  %s176_s28 = int_to_ptr.hbm [resolvable:$true] %s175_s28 }
   0xd   : > { %p1362_p8 = pnand %p919_p5, %p164_p7  ;;  %s177_s6 = sshll.u32 %s1279_s30, 4  ;;  %s178_s6 = int_to_ptr.vmem [resolvable:$true] %s177_s6 }
   0xe   : > { %s203_s10 = sshll.u32 %s1610_s3, 4  ;;  %s1280_s11 = smov 384   ;;  %s204_s10 = int_to_ptr.hbm [resolvable:$true] %s203_s10 }
   0xf   : > { %p976_p9 = pneg %p1362_p8  ;;  %s1281_s12 = smov 24  }
  0x10   : > { %s1282_s13 = smov [#allocation8]   ;;  %s1613_s15 = smov 128  }
  0x11   : > { %p1370_p10 = pnand %p976_p9, %p44_p1  ;;  %s205_s14 = sshll.u32 %s1282_s13, 4  ;;  %s206_s14 = int_to_ptr.vmem [resolvable:$true] %s205_s14 }
  0x12   : > { %s1284_s16 = smov 8   ;;  %s189_s26 = sshll.u32 %s1609_s2, 4  ;;  %s190_s26 = int_to_ptr.hbm [resolvable:$true] %s189_s26 }
  0x13   : > { %979 = dma.hbm_to_vmem [thread:$0]  (!%p1370_p10), %s176_s28, 3072, %s178_s6, [#allocation6], %s1280_s11, %s1280_s11, %s1281_s12  }
  0x14   : > { %985 = dma.hbm_to_vmem [thread:$0]  (!%p1370_p10), %s204_s10, 2048, %s206_s14, [#allocation9], %s1613_s15, %s1613_s15, %s1284_s16  }
  0x15   : > { %s1285_s27 = smov [#allocation7]   ;;  %s217_s8 = sshll.u32 %s1611_s4, 4  ;;  %s218_s8 = int_to_ptr.hbm [resolvable:$true] %s217_s8 }
  0x16   : > { %s191_s28 = sshll.u32 %s1285_s27, 4  ;;  %s1286_s9 = smov [#allocation10]   ;;  %s192_s28 = int_to_ptr.vmem [resolvable:$true] %s191_s28 }
  0x17   : > { %982 = dma.hbm_to_vmem [thread:$0]  (!%p1370_p10), %s190_s26, 6144, %s192_s28, [#allocation6], %s1280_s11, %s1280_s11, %s1281_s12  }
  0x18   : > { %s219_s10 = sshll.u32 %s1286_s9, 4  ;;  %s1399_s13 = sadd.s32 1, %s1277_s21   ;;  %s220_s10 = int_to_ptr.vmem [resolvable:$true] %s219_s10 }
  0x19   : > { %988 = dma.hbm_to_vmem [thread:$0]  (!%p1370_p10), %s218_s8, 512, %s220_s10, [#allocation9], %s1613_s15, %s1613_s15, %s1284_s16  }
  0x1a   : > { %s30_s14 = sadd.s32 1, %s1273_s20  ;;  %s27_s17 = ssub.s32 %s1277_s21, %s1399_s13 }
  0x1b   : > { %p37_p12 = scmp.ne.s32.totalorder %s1273_s20, %s1269_s19  ;;  %p28_p13 = scmp.eq.s32.totalorder %s27_s17, 0 }
  0x1c   : > { %p38_p0 = scmp.eq.s32.totalorder %s1277_s21, 0  ;;  %p1001_p5 = scmp.lt.s32.totalorder %s1277_s21, 2 }
  0x1d   : > { %p1409_p3 = por %p151_p2, %p37_p12  ;;  %s233_s7 = sand.u32 1, %s1273_s20  }
  0x1e   : > { %s1415_s12 = scalar_select %p28_p13, %s1273_s20, %s30_s14  }
  0x1f   : > { %p39_p7 = por %p38_p0, %p37_p12  ;;  %s925_s23 = sshll.u32 %s233_s7, 4 }
  0x20   : > { %s954_s26 = sshll.u32 %s1277_s21, 4  ;;  %s237_s6 = scalar_lea.vmem [#allocation2], %s925_s23 }
  0x21   : > { %s242_s30 = scalar_lea.hbm %s1607_s0, %s954_s26  ;;  %s245_s8 = sshll.u32 %s237_s6, 4  ;;  %s246_s8 = int_to_ptr.vmem [resolvable:$true] %s245_s8 }
  0x22   : > { %s243_s9 = sshll.u32 %s242_s30, 4  ;;  %p1422_p2 = pnand %p1001_p5, %p39_p7  ;;  %s244_s9 = int_to_ptr.hbm [resolvable:$true] %s243_s9 }
  0x23   : > { %s234_s14 = scalar_lea.sflag [#allocation3], %s233_s7  ;;  %s1173_s17 = sshra.s32 %s244_s9, 4  ;;  %s1174_s17 = int_to_ptr.hbm [resolvable:$true] %s1173_s17 }
  0x24   : > { %s1175_s15 = scalar_lea.hbm %s1174_s17, 16  ;;  %p1177_p10 = pneg %p1422_p2 }
  0x25   : > { %p1176_p9 = scmp.ne.s32.totalorder %s1174_s17, %s1175_s15  ;;  %s1180_s27 = scalar_lea.hbm %s1607_s0, 32 }
  0x26   : > { %p1181_p0 = scmp.lt.s32.totalorder %s1174_s17, %s1607_s0  ;;  %p1182_p5 = scmp.lt.s32.totalorder %s1180_s27, %s1175_s15 }
  0x27   : > { %p1178_p12 = pnand %p1177_p10, %p1176_p9 }
  0x28   : > { %p1183_p7 = por %p1182_p5, %p1181_p0 }
  0x29   : > { %p1179_p13 = pneg %p1178_p12 }
  0x2b   : > { %p1184_p11 = pnand %p1183_p7, %p1179_p13 }
  0x2d   : > { %1187 = shalt.err (!%p1184_p11)
}
  0x2e   : > { %s1620_s7 = smov 128   ;;  %257 = sbr.rel (%p1362_p8) target bundleno = 1012 (0x3f4), region = 40 }
  0x2f   : > { %992 = dma.hbm_to_vmem [thread:$0]  (!%p1422_p2), %s244_s9, 256, %s246_s8, %s234_s14, %s1620_s7, %s1620_s7, %s1284_s16  }
  0x30   : > { %s1442_s6 = sand.u32 (!%p1362_p8), 1, %s1269_s19  }
  0x31   : > { %s929_s15 = sshll.u32 (!%p1362_p8), %s1442_s6, 4  ;;  %s260_s17 = scalar_lea.sflag (!%p1362_p8), [#allocation3], %s1442_s6 }
  0x32   : > { %s1448_s26 = scalar_lea.vmem (!%p1362_p8), [#allocation2], %s929_s15 }
  0x33   : > { %1248 = dma.done.wait (%p1349_p4), %s260_s17, 256  }
  0x34   : > { %1250 = vsyncadd (%p1349_p4), %s260_s17, 4294967040 }
  0x35   : > { %1252 = dma.done.wait (%p44_p1), [#allocation6], 9216  }
  0x36   : > { %1254 = vsyncadd (%p44_p1), [#allocation6], 4294958080 }
  0x37   : > { %1256 = dma.done.wait (%p44_p1), [#allocation9], 2560  }
  0x38   : > { %1258 = vsyncadd (%p44_p1), [#allocation9], 4294964736  ;;  %v355_v0 = vld [vmem:[#allocation5 + $0xa8] sm:$0xff]  ;;  %v357_v1 = vld [vmem:[#allocation5 + $0xb8] sm:$0xff]  ;;  %vm358_vm0 = vcmask 523264   ;;  %vm434_vm1 = vcmask 130048  }
  0x39   : > { %v352_v2 = vld [vmem:[#allocation5 + $0x90] sm:$0xff]  ;;  %373 = vmatpush.msra.mxu0 %v355_v0  ;;  %419 = vmatpush.msra.mxu2 %v357_v1  ;;  %v354_v3 = vld [vmem:[#allocation5 + $0xa0] sm:$0xff]  ;;  %v349_v4 = vld [vmem:[#allocation5 + $0x78] sm:$0xff]  ;;  %vm513_vm2 = vcmask 1040384   ;;  %s955_s24 = sshll.u32 %s1340_s22, 4  ;;  %s310_s9 = scalar_lea.vmem [#allocation11], %s929_s15 }
  0x3a   : > { %v351_v5 = vld [vmem:[#allocation5 + $0x88] sm:$0xff]  ;;  %v346_v6 = vld [vmem:[#allocation5 + $0x60] sm:$0xff]  ;;  %v348_v7 = vld [vmem:[#allocation5 + $0x70] sm:$0xff]  ;;  %s803_s8 = scalar_lea.hbm %s1612_s5, %s955_s24  ;;  %s804_s10 = sshll.u32 %s310_s9, 4  ;;  %s805_s10 = int_to_ptr.vmem [resolvable:$true] %s804_s10 }
  0x3b   : > { %374 = vmatpush.msra.mxu0 %v352_v2  ;;  %420 = vmatpush.msra.mxu2 %v354_v3  ;;  %v343_v8 = vld [vmem:[#allocation5 + $0x48] sm:$0xff]  ;;  %v345_v9 = vld [vmem:[#allocation5 + $0x58] sm:$0xff]  ;;  %v340_v10 = vld [vmem:[#allocation5 + $0x30] sm:$0xff]  ;;  %s806_s14 = sshll.u32 %s803_s8, 4  ;;  %s792_s22 = scalar_lea.sflag [#allocation4], %s1442_s6  ;;  %s807_s14 = int_to_ptr.hbm [resolvable:$true] %s806_s14 }
  0x3c   : > { %v342_v11 = vld [vmem:[#allocation5 + $0x40] sm:$0xff]  ;;  %v337_v12 = vld [vmem:[#allocation5 + $0x18] sm:$0xff]  ;;  %v339_v13 = vld [vmem:[#allocation5 + $0x28] sm:$0xff]  ;;  %s1217_s23 = sshra.s32 %s807_s14, 4  ;;  %s1223_s7 = scalar_lea.hbm %s1612_s5, 32  ;;  %s1218_s23 = int_to_ptr.hbm [resolvable:$true] %s1217_s23 }
  0x3d   : > { %375 = vmatpush.msra.mxu0 %v349_v4  ;;  %421 = vmatpush.msra.mxu2 %v351_v5  ;;  %v334_v14 = vld [vmem:[#allocation5] sm:$0xff]  ;;  %v336_v15 = vld [vmem:[#allocation5 + $0x10] sm:$0xff]  ;;  %v333_v17 = vld [vmem:[%s1448_s26 + $0x8] sm:$0xff]  ;;  %s1219_s27 = scalar_lea.hbm %s1218_s23, 16  ;;  %p1224_p11 = scmp.lt.s32.totalorder %s1218_s23, %s1612_s5 }
  0x3e   : > { %v332_v16 = vld [vmem:[%s1448_s26] sm:$0xff]  ;;  %v353_v19 = vld [vmem:[#allocation5 + $0x98] sm:$0xff]  ;;  %v347_v21 = vld [vmem:[#allocation5 + $0x68] sm:$0xff]  ;;  %p1220_p1 = scmp.ne.s32.totalorder %s1218_s23, %s1219_s27  ;;  %p1225_p2 = scmp.lt.s32.totalorder %s1223_s7, %s1219_s27 }
  0x3f   : > { %376 = vmatpush.msra.mxu0 %v346_v6  ;;  %422 = vmatpush.msra.mxu2 %v348_v7  ;;  %v356_v18 = vld [vmem:[#allocation5 + $0xb0] sm:$0xff]  ;;  %v350_v20 = vld [vmem:[#allocation5 + $0x80] sm:$0xff]  ;;  %v341_v23 = vld [vmem:[#allocation5 + $0x38] sm:$0xff] }
  0x40   : > { %396 = vmatpush.msra.mxu1 %v356_v18  ;;  %v344_v22 = vld [vmem:[#allocation5 + $0x50] sm:$0xff]  ;;  %v338_v24 = vld [vmem:[#allocation5 + $0x20] sm:$0xff]  ;;  %v335_v25 = vld [vmem:[#allocation5 + $0x8] sm:$0xff]  ;;  %p1221_p4 = pnand %p1220_p1, %p1409_p3  ;;  %p1226_p9 = por %p1225_p2, %p1224_p11 }
  0x41   : > { %377 = vmatpush.msra.mxu0 %v343_v8  ;;  %423 = vmatpush.msra.mxu2 %v345_v9  ;;  %v1470_v29 = vld [vmem:[#allocation10] sm:$0xff]  ;;  %v1474_v31 = vld [vmem:[#allocation10 + $0x8] sm:$0xff]  ;;  %v1478_v32 = vld [vmem:[#allocation10 + $0x10] sm:$0xff] }
  0x42   : > { %397 = vmatpush.msra.mxu1 %v353_v19  ;;  %v1482_v33 = vld [vmem:[#allocation10 + $0x18] sm:$0xff]  ;;  %v1488_v35 = vld [vmem:[#allocation8 + $0x70] sm:$0xff]  ;;  %v1492_v36 = vld [vmem:[#allocation8 + $0x68] sm:$0xff]  ;;  %p1222_p8 = pneg %p1221_p4 }
  0x43   : > { %378 = vmatpush.msra.mxu0 %v340_v10  ;;  %424 = vmatpush.msra.mxu2 %v342_v11  ;;  %v1486_v34 = vld [vmem:[#allocation8 + $0x78] sm:$0xff]  ;;  %v1495_v37 = vld [vmem:[#allocation8 + $0x60] sm:$0xff]  ;;  %v1500_v39 = vld [vmem:[#allocation8 + $0x50] sm:$0xff] }
  0x44   : > { %398 = vmatpush.msra.mxu1 %v350_v20  ;;  %v1498_v38 = vld [vmem:[#allocation8 + $0x58] sm:$0xff]  ;;  %v1504_v40 = vld [vmem:[#allocation8 + $0x48] sm:$0xff]  ;;  %v1507_v41 = vld [vmem:[#allocation8 + $0x40] sm:$0xff]  ;;  %p1227_p10 = pnand %p1226_p9, %p1222_p8 }
  0x45   : > { %379 = vmatpush.msra.mxu0 %v337_v12  ;;  %425 = vmatpush.msra.mxu2 %v339_v13  ;;  %v1510_v42 = vld [vmem:[#allocation8 + $0x38] sm:$0xff]  ;;  %v1513_v43 = vld [vmem:[#allocation8 + $0x30] sm:$0xff]  ;;  %v1516_v45 = vld [vmem:[#allocation8 + $0x28] sm:$0xff] }
  0x46   : > { %399 = vmatpush.msra.mxu1 %v347_v21  ;;  %v1519_v46 = vld [vmem:[#allocation8 + $0x20] sm:$0xff]  ;;  %v1521_v47 = vld [vmem:[#allocation8 + $0x18] sm:$0xff]  ;;  %v1524_v48 = vld [vmem:[#allocation8 + $0x10] sm:$0xff] }
  0x47   : > { %380 = vmatpush.msra.mxu0 %v334_v14  ;;  %426 = vmatpush.msra.mxu2 %v336_v15  ;;  %v1527_v49 = vld [vmem:[#allocation8 + $0x8] sm:$0xff]  ;;  %v1530_v51 = vld [vmem:[#allocation8] sm:$0xff]  ;;  %v606_v14 = vld [vmem:[#allocation7 + $0x170] sm:$0xff] }
  0x48   : > { %935 = vmatmul.msk.f32.vlgmr.msra.gmra.mxu0 %vm358_vm0, %v332_v16  ;;  %939 = vmatmul.msk.f32.vlgmr.msra.gmra.mxu2 %vm358_vm0, %v332_v16  ;;  %v605_v13 = vld [vmem:[#allocation7 + $0x168] sm:$0xff]  ;;  %v607_v15 = vld [vmem:[#allocation7 + $0x178] sm:$0xff]  ;;  %v604_v18 = vld [vmem:[#allocation7 + $0x160] sm:$0xff] }
  0x49   : > { %400 = vmatpush.msra.mxu1 %v344_v22  ;;  %515 = vmatpush.msrb.mxu0 %v1486_v34  ;;  %v599_v19 = vld [vmem:[#allocation7 + $0x138] sm:$0xff]  ;;  %v600_v20 = vld [vmem:[#allocation7 + $0x140] sm:$0xff]  ;;  %v601_v21 = vld [vmem:[#allocation7 + $0x148] sm:$0xff] }
  0x4a   : > { %631 = vmatpush.msrb.mxu2 %v606_v14  ;;  %v596_v22 = vld [vmem:[#allocation7 + $0x120] sm:$0xff] }
  0x4b   : > { %401 = vmatpush.msra.mxu1 %v341_v23  ;;  %516 = vmatpush.msrb.mxu0 %v1488_v35  ;;  %v597_v23 = vld [vmem:[#allocation7 + $0x128] sm:$0xff]  ;;  %v564_v14 = vld [vmem:[#allocation7 + $0x20] sm:$0xff] }
  0x4d   : > { %402 = vmatpush.msra.mxu1 %v338_v24  ;;  %517 = vmatpush.msrb.mxu0 %v1492_v36  ;;  %v598_v24 = vld [vmem:[#allocation7 + $0x130] sm:$0xff] }
  0x4f   : > { %403 = vmatpush.msra.mxu1 %v335_v25  ;;  %518 = vmatpush.msrb.mxu0 %v1495_v37  ;;  %v593_v25 = vld [vmem:[#allocation7 + $0x108] sm:$0xff] }
  0x50   : > { %936 = vmatmul.msk.f32.gmra.mxu0 %vm358_vm0, %v333_v17  ;;  %940 = vmatmul.msk.f32.gmra.mxu2 %vm358_vm0, %v333_v17 }
  0x51   : > { %937 = vmatmul.msk.f32.vlgmr.msra.gmra.mxu1 %vm358_vm0, %v332_v16  ;;  %519 = vmatpush.msrb.mxu0 %v1498_v38  ;;  %v602_v16 = vld [vmem:[#allocation7 + $0x150] sm:$0xff] }
  0x52   : > { %608 = vmatpush.msrb.mxu1 %v605_v13  ;;  %v563_v13 = vld [vmem:[#allocation7 + $0x18] sm:$0xff] }
  0x53   : > { %520 = vmatpush.msrb.mxu0 %v1500_v39 }
  0x54   : > { %609 = vmatpush.msrb.mxu1 %v602_v16  ;;  %v560_v16 = vld [vmem:[#allocation7] sm:$0xff] }
  0x55   : > { %521 = vmatpush.msrb.mxu0 %v1504_v40 }
  0x56   : > { %610 = vmatpush.msrb.mxu1 %v599_v19  ;;  %v562_v19 = vld [vmem:[#allocation7 + $0x10] sm:$0xff] }
  0x57   : > { %522 = vmatpush.msrb.mxu0 %v1507_v41 }
  0x58   : > { %611 = vmatpush.msrb.mxu1 %v596_v22 }
  0x59   : > { %938 = vmatmul.msk.f32.gmra.mxu1 %vm358_vm0, %v333_v17  ;;  %523 = vmatpush.msrb.mxu0 %v1510_v42  ;;  %v603_v17 = vld [vmem:[#allocation7 + $0x158] sm:$0xff] }
  0x5a   : > { %632 = vmatpush.msrb.mxu2 %v603_v17  ;;  %612 = vmatpush.msrb.mxu1 %v593_v25  ;;  %v561_v17 = vld [vmem:[#allocation7 + $0x8] sm:$0xff] }
  0x5b   : > { %524 = vmatpush.msrb.mxu0 %v1513_v43 }
  0x5c   : > { %633 = vmatpush.msrb.mxu2 %v600_v20 }
  0x5d   : > { %525 = vmatpush.msrb.mxu0 %v1516_v45 }
  0x5e   : > { %634 = vmatpush.msrb.mxu2 %v597_v23 }
  0x5f   : > { %526 = vmatpush.msrb.mxu0 %v1519_v46 }
  0x61   : > { %527 = vmatpush.msrb.mxu0 %v1521_v47 }
  0x63   : > { %528 = vmatpush.msrb.mxu0 %v1524_v48 }
  0x65   : > { %529 = vmatpush.msrb.mxu0 %v1527_v49 }
  0x67   : > { %530 = vmatpush.msrb.mxu0 %v1530_v51 }
  0xc5   : > { %v382_v26 = vpop.f32.mrf.mxu0 }
  0xcb   : > { %v428_v27 = vpop.f32.mrf.mxu2 }
  0xcd   : > { %v385_v28 = vpop.f32.mrf.mxu0 }
  0xce   : > { %455 = vmatpush.msra.mxu3 %v385_v28  ;;  %v405_v52 = vpop.f32.mrf.mxu1  ;;  %v590_v28 = vld [vmem:[#allocation7 + $0xf0] sm:$0xff] }
  0xcf   : > { %613 = vmatpush.msrb.mxu1 %v590_v28 }
  0xd0   : > { %456 = vmatpush.msra.mxu3 %v382_v26  ;;  %v594_v26 = vld [vmem:[#allocation7 + $0x110] sm:$0xff] }
  0xd1   : > { %941 = vmatmul.msk.f32.vlgmr.msra.gmra.mxu3 %vm434_vm1, %v1470_v29  ;;  %635 = vmatpush.msrb.mxu2 %v594_v26 }
  0xd3   : > { %v431_v30 = vpop.f32.mrf.mxu2 }
  0xd4   : > { %486 = vmatpush.msrb.mxu3 %v431_v30  ;;  %v591_v30 = vld [vmem:[#allocation7 + $0xf8] sm:$0xff] }
  0xd5   : > { %636 = vmatpush.msrb.mxu2 %v591_v30 }
  0xd6   : > { %487 = vmatpush.msrb.mxu3 %v428_v27  ;;  %v408_v54 = vpop.f32.mrf.mxu1  ;;  %v595_v27 = vld [vmem:[#allocation7 + $0x118] sm:$0xff] }
  0xd8   : > { %654 = vmatpush.msra.mxu3 %v607_v15  ;;  %v565_v15 = vld [vmem:[#allocation7 + $0x28] sm:$0xff] }
  0xd9   : > { %942 = vmatmul.msk.f32.gmra.mxu3 %vm434_vm1, %v1474_v31 }
  0xda   : > { %655 = vmatpush.msra.mxu3 %v604_v18 }
  0xdc   : > { %656 = vmatpush.msra.mxu3 %v601_v21 }
  0xde   : > { %657 = vmatpush.msra.mxu3 %v598_v24 }
  0xe0   : > { %658 = vmatpush.msra.mxu3 %v595_v27 }
  0xe1   : > { %943 = vmatmul.msk.f32.vlgmr.msrb.gmra.mxu3 %vm434_vm1, %v1478_v32 }
  0xe9   : > { %944 = vmatmul.msk.f32.gmra.mxu3 %vm434_vm1, %v1482_v33 }
 0x154   : > { %v458_v44 = vpop.f32.mrf.mxu3 }
 0x155   : > { %v464_v55 = vadd.f32 %v458_v44, %v405_v52  ;;  %v592_v44 = vld [vmem:[#allocation7 + $0x100] sm:$0xff] }
 0x156   : > { %659 = vmatpush.msra.mxu3 %v592_v44  ;;  %v588_v52 = vld [vmem:[#allocation7 + $0xe0] sm:$0xff] }
 0x157   : > { %637 = vmatpush.msrb.mxu2 %v588_v52 }
 0x15c   : > { %v461_v50 = vpop.f32.mrf.mxu3 }
 0x15d   : > { %v465_v56 = vadd.f32 %v461_v50, %v408_v54  ;;  %v587_v50 = vld [vmem:[#allocation7 + $0xd8] sm:$0xff]  ;;  %v584_v54 = vld [vmem:[#allocation7 + $0xc0] sm:$0xff] }
 0x15e   : > { %614 = vmatpush.msrb.mxu1 %v587_v50 }
 0x160   : > { %615 = vmatpush.msrb.mxu1 %v584_v54 }
 0x164   : > { %v489_v53 = vpop.f32.mrf.mxu3 }
 0x165   : > { %v1534_v57 = vadd.f32 %v489_v53, %v464_v55  ;;  %v589_v53 = vld [vmem:[#allocation7 + $0xe8] sm:$0xff] }
 0x166   : > { %660 = vmatpush.msra.mxu3 %v589_v53  ;;  %v585_v55 = vld [vmem:[#allocation7 + $0xc8] sm:$0xff] }
 0x167   : > { %v504_v60 = vmul.f32 %v1534_v57, %v1534_v57  ;;  %638 = vmatpush.msrb.mxu2 %v585_v55 }
 0x16c   : > { %v492_v58 = vpop.f32.mrf.mxu3 }
 0x16d   : > { %v1536_v59 = vadd.f32 %v492_v58, %v465_v56  ;;  %v586_v56 = vld [vmem:[#allocation7 + $0xd0] sm:$0xff]  ;;  %v581_v58 = vld [vmem:[#allocation7 + $0xa8] sm:$0xff] }
 0x16e   : > { %661 = vmatpush.msra.mxu3 %v586_v56  ;;  %616 = vmatpush.msrb.mxu1 %v581_v58 }
 0x16f   : > { %v497_v61 = vadd.f32 %v1536_v59, %v1534_v57  ;;  %v505_v62 = vmul.f32 %v1536_v59, %v1536_v59 }
 0x171   : > { %v498_v63 = vrot.slane %v497_v61, 4  ;;  %v506_v0 = vadd.f32 %v505_v62, %v504_v60  ;;  %v582_v60 = vld [vmem:[#allocation7 + $0xb0] sm:$0xff] }
 0x172   : > { %639 = vmatpush.msrb.mxu2 %v582_v60  ;;  %v578_v62 = vld [vmem:[#allocation7 + $0x90] sm:$0xff] }
 0x173   : > { %v499_v1 = vadd.f32 %v498_v63, %v497_v61  ;;  %v507_v2 = vrot.slane %v506_v0, 4  ;;  %v583_v61 = vld [vmem:[#allocation7 + $0xb8] sm:$0xff]  ;;  %617 = vmatpush.msrb.mxu1 %v578_v62 }
 0x174   : > { %662 = vmatpush.msra.mxu3 %v583_v61  ;;  %v579_v63 = vld [vmem:[#allocation7 + $0x98] sm:$0xff] }
 0x175   : > { %v500_v3 = vrot.slane %v499_v1, 2  ;;  %v508_v4 = vadd.f32 %v507_v2, %v506_v0  ;;  %v580_v0 = vld [vmem:[#allocation7 + $0xa0] sm:$0xff]  ;;  %640 = vmatpush.msrb.mxu2 %v579_v63 }
 0x176   : > { %663 = vmatpush.msra.mxu3 %v580_v0  ;;  %v576_v2 = vld [vmem:[#allocation7 + $0x80] sm:$0xff] }
 0x177   : > { %v501_v5 = vadd.f32 %v500_v3, %v499_v1  ;;  %v509_v6 = vrot.slane %v508_v4, 2  ;;  %v575_v1 = vld [vmem:[#allocation7 + $0x78] sm:$0xff]  ;;  %v577_v3 = vld [vmem:[#allocation7 + $0x88] sm:$0xff]  ;;  %641 = vmatpush.msrb.mxu2 %v576_v2 }
 0x178   : > { %618 = vmatpush.msrb.mxu1 %v575_v1  ;;  %664 = vmatpush.msra.mxu3 %v577_v3 }
 0x179   : > { %v502_v7 = vrot.slane %v501_v5, 1  ;;  %v510_v8 = vadd.f32 %v509_v6, %v508_v4  ;;  %v572_v4 = vld [vmem:[#allocation7 + $0x60] sm:$0xff]  ;;  %v574_v6 = vld [vmem:[#allocation7 + $0x70] sm:$0xff] }
 0x17a   : > { %619 = vmatpush.msrb.mxu1 %v572_v4  ;;  %665 = vmatpush.msra.mxu3 %v574_v6 }
 0x17b   : > { %v511_v9 = vrot.slane %v510_v8, 1  ;;  %v503_v10 = vadd.f32 %v502_v7, %v501_v5  ;;  %v573_v5 = vld [vmem:[#allocation7 + $0x68] sm:$0xff] }
 0x17c   : > { %v569_v7 = vld [vmem:[#allocation7 + $0x48] sm:$0xff]  ;;  %642 = vmatpush.msrb.mxu2 %v573_v5 }
 0x17d   : > { %v512_v11 = vadd.f32 %v511_v9, %v510_v8  ;;  %v570_v8 = vld [vmem:[#allocation7 + $0x50] sm:$0xff]  ;;  %v571_v9 = vld [vmem:[#allocation7 + $0x58] sm:$0xff]  ;;  %620 = vmatpush.msrb.mxu1 %v569_v7 }
 0x17e   : > { %643 = vmatpush.msrb.mxu2 %v570_v8  ;;  %666 = vmatpush.msra.mxu3 %v571_v9 }
 0x17f   : > { %v514_v12 = vsel %vm513_vm2, %v503_v10, %v512_v11  ;;  %v566_v10 = vld [vmem:[#allocation7 + $0x30] sm:$0xff]  ;;  %v567_v11 = vld [vmem:[#allocation7 + $0x38] sm:$0xff] }
 0x180   : > { %531 = vmatmul.f32.vlgmr.msrb.gmra.mxu0 %v514_v12  ;;  %v568_v12 = vld [vmem:[#allocation7 + $0x40] sm:$0xff]  ;;  %621 = vmatpush.msrb.mxu1 %v566_v10 }
 0x181   : > { %644 = vmatpush.msrb.mxu2 %v567_v11  ;;  %667 = vmatpush.msra.mxu3 %v568_v12 }
 0x182   : > { %622 = vmatpush.msrb.mxu1 %v563_v13 }
 0x183   : > { %645 = vmatpush.msrb.mxu2 %v564_v14  ;;  %668 = vmatpush.msra.mxu3 %v565_v15 }
 0x184   : > { %623 = vmatpush.msrb.mxu1 %v560_v16 }
 0x185   : > { %646 = vmatpush.msrb.mxu2 %v561_v17  ;;  %669 = vmatpush.msra.mxu3 %v562_v19 }
 0x187   : > { %744 = vmatpush.msra.mxu2 %v1486_v34 }
 0x189   : > { %745 = vmatpush.msra.mxu2 %v1488_v35 }
 0x18b   : > { %746 = vmatpush.msra.mxu2 %v1492_v36 }
 0x18d   : > { %747 = vmatpush.msra.mxu2 %v1495_v37 }
 0x18f   : > { %748 = vmatpush.msra.mxu2 %v1498_v38 }
 0x191   : > { %749 = vmatpush.msra.mxu2 %v1500_v39 }
 0x193   : > { %750 = vmatpush.msra.mxu2 %v1504_v40 }
 0x195   : > { %751 = vmatpush.msra.mxu2 %v1507_v41 }
 0x197   : > { %752 = vmatpush.msra.mxu2 %v1510_v42 }
 0x199   : > { %753 = vmatpush.msra.mxu2 %v1513_v43 }
 0x19b   : > { %754 = vmatpush.msra.mxu2 %v1516_v45 }
 0x19d   : > { %755 = vmatpush.msra.mxu2 %v1519_v46 }
 0x19f   : > { %756 = vmatpush.msra.mxu2 %v1521_v47 }
 0x1a1   : > { %757 = vmatpush.msra.mxu2 %v1524_v48 }
 0x1a3   : > { %758 = vmatpush.msra.mxu2 %v1527_v49 }
 0x1a5   : > { %759 = vmatpush.msra.mxu2 %v1530_v51 }
 0x1fd   : > { %v532_v18 = vpop.f32.mrf.mxu0 }
 0x1fe   : > { %v535_v20 = vmul.f32 0.00390625, %v532_v18 }
 0x200   : > { %v536_v21 = vmul.f32 %v535_v20, %v535_v20  ;;  %v541_v26 = vperm.slane %v535_v20, 0 }
 0x202   : > { %v538_v22 = vrot.slane %v536_v21, 7  ;;  %v542_v40 = vsub.f32 %v1534_v57, %v541_v26  ;;  %v543_v45 = vsub.f32 %v1536_v59, %v541_v26 }
 0x204   : > { %v540_v23 = vsub.f32 %v535_v20, %v538_v22 }
 0x206   : > { %v544_v24 = vadd.f32 1e-05, %v540_v23 }
 0x208   : > { %1049 = vrsqrt.f32 %v544_v24  ;;  %vm551_vm4 = vweird.f32 %v544_v24 }
 0x20e   : > { %v1050_v25 = vpop.eup %1049 }
 0x20f   : > { %v546_v34 = vmul.f32 %v1050_v25, %v544_v24  ;;  %vm552_vm3 = vweird.f32 %v1050_v25 }
 0x210   : > { %vm553_vm5 = vmor %vm551_vm4, %vm552_vm3 }
 0x211   : > { %v547_v35 = vmul.f32 %v1050_v25, %v546_v34 }
 0x213   : > { %v548_v36 = vmul.f32 0.5, %v547_v35 }
 0x215   : > { %v549_v37 = vsub.f32 1.5, %v548_v36 }
 0x217   : > { %v550_v38 = vmul.f32 %v1050_v25, %v549_v37 }
 0x219   : > { %v554_v39 = vsel %vm553_vm5, %v1050_v25, %v550_v38 }
 0x21a   : > { %v555_v41 = vperm.slane %v554_v39, 1 }
 0x21c   : > { %v556_v42 = vmul.f32 %v555_v41, %v542_v40  ;;  %v557_v46 = vmul.f32 %v555_v41, %v543_v45 }
 0x21e   : > { %v558_v43 = vmax.f32 %v556_v42, 0.0  ;;  %v559_v27 = vmax.f32 %v557_v46, 0.0 }
 0x220   : > { %624 = vmatmul.f32.vlgmr.msrb.gmra.mxu1 %v558_v43  ;;  %647 = vmatmul.f32.vlgmr.msrb.gmra.mxu2 %v558_v43 }
 0x221   : > { %670 = vmatmul.f32.vlgmr.msra.gmra.mxu3 %v558_v43 }
 0x228   : > { %627 = vmatmul.f32.gmra.mxu1 %v559_v27  ;;  %650 = vmatmul.f32.gmra.mxu2 %v559_v27 }
 0x229   : > { %673 = vmatmul.f32.gmra.mxu3 %v559_v27 }
 0x29d   : > { %v625_v47 = vpop.f32.mrf.mxu1 }
 0x2a3   : > { %v648_v51 = vpop.f32.mrf.mxu2 }
 0x2a4   : > { %v671_v57 = vpop.f32.mrf.mxu3 }
 0x2a5   : > { %v628_v28 = vpop.f32.mrf.mxu1 }
 0x2a6   : > { %691 = vmatpush.msra.mxu0 %v628_v28 }
 0x2a8   : > { %692 = vmatpush.msra.mxu0 %v625_v47 }
 0x2a9   : > { %945 = vmatmul.msk.f32.vlgmr.msra.gmra.mxu0 %vm434_vm1, %v1470_v29 }
 0x2ab   : > { %v651_v50 = vpop.f32.mrf.mxu2 }
 0x2ac   : > { %v674_v48 = vpop.f32.mrf.mxu3 }
 0x2ad   : > { %716 = vmatpush.msra.mxu1 %v674_v48 }
 0x2af   : > { %717 = vmatpush.msra.mxu1 %v671_v57 }
 0x2b0   : > { %947 = vmatmul.msk.f32.vlgmr.msra.gmra.mxu1 %vm434_vm1, %v1478_v32 }
 0x2b1   : > { %946 = vmatmul.msk.f32.gmra.mxu0 %vm434_vm1, %v1474_v31 }
 0x2b8   : > { %948 = vmatmul.msk.f32.gmra.mxu1 %vm434_vm1, %v1482_v33 }
 0x326   : > { %v694_v49 = vpop.f32.mrf.mxu0 }
 0x327   : > { %v700_v44 = vadd.f32 %v694_v49, %v648_v51 }
 0x32d   : > { %v719_v59 = vpop.f32.mrf.mxu1 }
 0x32e   : > { %v697_v30 = vpop.f32.mrf.mxu0  ;;  %v725_v52 = vadd.f32 %v719_v59, %v700_v44 }
 0x32f   : > { %v701_v29 = vadd.f32 %v697_v30, %v651_v50 }
 0x330   : > { %v734_v55 = vmul.f32 %v725_v52, %v725_v52 }
 0x335   : > { %v722_v53 = vpop.f32.mrf.mxu1 }
 0x336   : > { %v726_v54 = vadd.f32 %v722_v53, %v701_v29 }
 0x338   : > { %v727_v56 = vadd.f32 %v726_v54, %v725_v52  ;;  %v735_v58 = vmul.f32 %v726_v54, %v726_v54 }
 0x33a   : > { %v728_v32 = vrot.slane %v727_v56, 4  ;;  %v736_v60 = vadd.f32 %v735_v58, %v734_v55 }
 0x33c   : > { %v729_v61 = vadd.f32 %v728_v32, %v727_v56  ;;  %v737_v31 = vrot.slane %v736_v60, 4 }
 0x33e   : > { %v730_v62 = vrot.slane %v729_v61, 2  ;;  %v738_v63 = vadd.f32 %v737_v31, %v736_v60 }
 0x340   : > { %v731_v33 = vadd.f32 %v730_v62, %v729_v61  ;;  %v739_v0 = vrot.slane %v738_v63, 2 }
 0x342   : > { %v732_v1 = vrot.slane %v731_v33, 1  ;;  %v740_v2 = vadd.f32 %v739_v0, %v738_v63 }
 0x344   : > { %v741_v3 = vrot.slane %v740_v2, 1  ;;  %v733_v4 = vadd.f32 %v732_v1, %v731_v33 }
 0x346   : > { %v742_v5 = vadd.f32 %v741_v3, %v740_v2 }
 0x348   : > { %v743_v6 = vsel %vm513_vm2, %v733_v4, %v742_v5 }
 0x349   : > { %760 = vmatmul.f32.vlgmr.msra.gmra.mxu2 %v743_v6 }
 0x3cc   : > { %v761_v7 = vpop.f32.mrf.mxu2 }
 0x3cd   : > { %v764_v8 = vmul.f32 0.00390625, %v761_v7 }
 0x3cf   : > { %v765_v9 = vmul.f32 %v764_v8, %v764_v8  ;;  %v770_v18 = vperm.slane %v764_v8, 0 }
 0x3d1   : > { %v767_v10 = vrot.slane %v765_v9, 7  ;;  %v771_v21 = vsub.f32 %v725_v52, %v770_v18  ;;  %v772_v22 = vsub.f32 %v726_v54, %v770_v18 }
 0x3d3   : > { %v769_v11 = vsub.f32 %v764_v8, %v767_v10 }
 0x3d5   : > { %v773_v12 = vadd.f32 1e-05, %v769_v11 }
 0x3d7   : > { %1051 = vrsqrt.f32 %v773_v12  ;;  %vm780_vm7 = vweird.f32 %v773_v12 }
 0x3dd   : > { %v1052_v13 = vpop.eup %1051 }
 0x3de   : > { %v775_v14 = vmul.f32 %v1052_v13, %v773_v12  ;;  %vm781_vm6 = vweird.f32 %v1052_v13 }
 0x3df   : > { %vm782_vm8 = vmor %vm780_vm7, %vm781_vm6 }
 0x3e0   : > { %v776_v15 = vmul.f32 %v1052_v13, %v775_v14 }
 0x3e2   : > { %v777_v16 = vmul.f32 0.5, %v776_v15 }
 0x3e4   : > { %v778_v17 = vsub.f32 1.5, %v777_v16 }
 0x3e6   : > { %v779_v19 = vmul.f32 %v1052_v13, %v778_v17 }
 0x3e8   : > { %v783_v20 = vsel %vm782_vm8, %v1052_v13, %v779_v19 }
 0x3e9   : > { %v784_v23 = vperm.slane %v783_v20, 1 }
 0x3eb   : > { %v785_v24 = vmul.f32 %v784_v23, %v771_v21  ;;  %v786_v25 = vmul.f32 %v784_v23, %v772_v22 }
 0x3ed   : > { %v787_v34 = vmax.f32 %v785_v24, 0.0  ;;  %v788_v35 = vmax.f32 %v786_v25, 0.0 }
 0x3ef   : > { %789 = vst [vmem:[%s310_s9] sm:$0xff] %v787_v34 }
 0x3f0   : > { %790 = vst [vmem:[%s310_s9 + $0x8] sm:$0xff] %v788_v35 }
 0x3f1   : > { %1230 = shalt.err (!%p1227_p10)
}
 0x3f2   : > { %s1287_s6 = smov 128   ;;  %s1288_s26 = smov 8  }
 0x3f3   : > { %974 = dma.vmem_to_hbm [thread:$0]  (%p1409_p3), %s805_s10, 256, %s807_s14, %s792_s22, %s1287_s6, %s1287_s6, %s1288_s26  }
 0x3f4 PF: > { %s821_s24 = sand.u32 1, %s1265_s18   ;;  %p1621_p12 = scmp.ge.s32.totalorder %s1277_s21, 2 }
 0x3f5   : > { %s822_s29 = scalar_lea.sflag [#allocation4], %s821_s24 }
 0x3f6   : > { %p994_p13 = pnand %p1621_p12, %p1354_p6 }
 0x3f8   : > { %p995_p0 = pneg %p994_p13 }
 0x3fa   : > { %1260 = dma.done.wait (%p995_p0), %s822_s29, 256  }
 0x3fb   : > { %1262 = vsyncadd (%p995_p0), %s822_s29, 4294967040  ;;  %p20_p5 = scmp.ge.s32.totalorder %s1399_s13, 4   ;;  %s1622_s18 = smov %s1269_s19 }
 0x3fc   : > { %s1623_s19 = smov %s1273_s20  ;;  %s1624_s20 = smov %s1415_s12 }
 0x3fd   : > { %s1625_s21 = smov %s1399_s13  ;;  %22 = sbr.rel (!%p20_p5) target bundleno = 7 (0x7), region = 102 }
 0x402   :  { %828 = vsyncpa [#allocation3], 1 }
 0x403   :  { %830 = vsyncpa [#allocation3 + $0x1], 1 }
 0x404   :  { %831 = vsyncpa [#allocation6], 1 }
 0x405   :  { %832 = vsyncpa [#allocation9], 1 }
 0x406   :  { %833 = vsyncpa [#allocation4], 1 }
 0x407   :  { %835 = vsyncpa [#allocation4 + $0x1], 1 }

</bundles_post_ra>
